<compile_context>
chip_gen: v5e
topology: v5e:2x2
jax: 0.10.0
libtpu: 0.0.40
codegen_flags: <defaults>
</compile_context>

<pallas_src>
import functools

import jax
import jax.numpy as jnp
from jax.experimental import pallas as pl
from jax.experimental.pallas import tpu as pltpu

_LANES = 128          # vreg lane width (last dim)
_SUBLANES = 8         # vreg sublane count (second-to-last dim)
_MAX_BLOCK_ROWS = 8192  # (8192,128) f32 = 4 MiB / input tile


def _logistic_kernel(w_ref, x_ref, o_ref, acc_ref, *, block_rows,
                     blocks_per_split, valid_rows, needs_mask):
    k = pl.program_id(1)

    @pl.when(k == 0)
    def _init():
        acc_ref[...] = jnp.zeros_like(acc_ref)

    prod = w_ref[...] * x_ref[...]

    if needs_mask:
        # Only the globally-last block can overrun `valid_rows`; the iota /
        # compare / select are VPU ops and free filler at the HBM roofline.
        row0 = (pl.program_id(0) * blocks_per_split + k) * block_rows
        row_ids = jax.lax.broadcasted_iota(jnp.int32, (block_rows, _LANES), 0) + row0
        prod = jnp.where(row_ids < valid_rows, prod, 0.0)

    # Fold sublane groups into a single-vreg (8,128) accumulator: the axis-0
    # sum is vreg-aligned elementwise adds (pure VPU, no XLU), and the
    # accumulator read-modify-write touches one vreg instead of a full block.
    acc_ref[...] += prod.reshape(block_rows // _SUBLANES, _SUBLANES, _LANES).sum(axis=0)

    @pl.when(k == pl.num_programs(1) - 1)
    def _finalize():
        # Lane-dense (8,128) partial-sum store; the cross-lane reduce and the
        # sigmoid are done once, on a tiny slab, in the wrapper.
        o_ref[...] = acc_ref[...]


def logistic_classifier_forward(weights: jax.Array, x_vector: jax.Array) -> jax.Array:
    """weights: (F,) f32, x_vector: (F,) f32 -> scalar probability (f32)."""
    assert weights.ndim == 1 and weights.shape == x_vector.shape
    f = weights.shape[0]

    w = weights.astype(jnp.float32)
    x = x_vector.astype(jnp.float32)

    # Lane/sublane-dense layout: pad only to the next (8*128)-element boundary
    # (<= 1023 zeros; zero padding contributes nothing to the dot product).
    rows = pl.cdiv(pl.cdiv(f, _LANES), _SUBLANES) * _SUBLANES
    padded = rows * _LANES
    if padded != f:
        w = jnp.pad(w, (0, padded - f))
        x = jnp.pad(x, (0, padded - f))
    w2 = w.reshape(rows, _LANES)
    x2 = x.reshape(rows, _LANES)

    # Split the streaming reduction into two core-groups (v7x dual TensorCore);
    # on single-TC chips the second group simply runs after the first.
    num_splits = 2 if rows > _SUBLANES else 1
    blocks_per_split = pl.cdiv(pl.cdiv(rows, num_splits), _MAX_BLOCK_ROWS)
    total_blocks = num_splits * blocks_per_split
    # Near-equal blocks, sublane-aligned; any overrun past `rows` is masked
    # in-kernel, so rows are never padded up to a whole block multiple.
    block_rows = pl.cdiv(pl.cdiv(rows, total_blocks), _SUBLANES) * _SUBLANES
    needs_mask = (total_blocks * block_rows) != rows

    kernel = functools.partial(
        _logistic_kernel,
        block_rows=block_rows,
        blocks_per_split=blocks_per_split,
        valid_rows=rows,
        needs_mask=needs_mask,
    )

    partials = pl.pallas_call(
        kernel,
        out_shape=jax.ShapeDtypeStruct((num_splits * _SUBLANES, _LANES), jnp.float32),
        grid_spec=pltpu.PrefetchScalarGridSpec(
            num_scalar_prefetch=0,
            grid=(num_splits, blocks_per_split),
            in_specs=[
                pl.BlockSpec((block_rows, _LANES),
                             lambda c, k: (c * blocks_per_split + k, 0)),
                pl.BlockSpec((block_rows, _LANES),
                             lambda c, k: (c * blocks_per_split + k, 0)),
            ],
            out_specs=pl.BlockSpec((_SUBLANES, _LANES), lambda c, k: (c, 0)),
            scratch_shapes=[pltpu.VMEM((_SUBLANES, _LANES), jnp.float32)],
        ),
        compiler_params=pltpu.CompilerParams(
            # Core-group axis is parallel (v7x dual TC); feature-block axis is
            # a sequential reduction.
            dimension_semantics=("parallel", "arbitrary"),
            # 16 MiB of double-buffered input tiles at block_rows=8192 needs
            # more than v5e's 16 MiB scoped default; 40 MiB stays under v7x's
            # 64 MiB physical VMEM.
            vmem_limit_bytes=40 * 1024 * 1024,
        ),
    )(w2, x2)

    # Final combine: one tiny cross-lane reduce + numerically stable sigmoid.
    return jax.nn.sigmoid(jnp.sum(partials))


if __name__ == "__main__":
    key = jax.random.PRNGKey(0)
    ks = jax.random.split(key, 8)

    def check(f, kw, kx, scale, rtol=1e-5, atol=1e-6):
        w = jax.random.normal(kw, (f,), dtype=jnp.float32) * scale
        x = jax.random.normal(kx, (f,), dtype=jnp.float32)
        p = jax.block_until_ready(logistic_classifier_forward(w, x))
        r = jax.nn.sigmoid(jnp.dot(w, x))
        assert jnp.allclose(p, r, rtol=rtol, atol=atol), (f, p, r)
        return w, x

    # Case 1: small, lane-aligned F (single block, no pad, no mask).
    w1, x1 = check(128, ks[0], ks[1], scale=0.1)

    # Case 2: non-aligned F (exercises the small lane/sublane pad).
    check(300, ks[2], ks[3], scale=0.1)

    # Case 3: F = 24*128 -> dual split + in-kernel ragged-tail mask, no pad.
    check(3072, ks[4], ks[5], scale=0.02)

    # Case 4: awkward F -> lane pad + dual split + ragged-tail mask.
    check(50_000, ks[6], ks[7], scale=0.01, rtol=1e-4, atol=1e-5)

    # Case 5: zero-initialized weights (nn.Parameter(torch.zeros(F))) -> 0.5.
    p0 = jax.block_until_ready(
        logistic_classifier_forward(jnp.zeros((128,), jnp.float32), x1))
    assert jnp.allclose(p0, 0.5, atol=1e-6), p0

    print("KERNEL_OK")
</pallas_src>

<mosaic_0001>
module attributes {stable_mosaic.version = 11 : i64} {
  func.func @_logistic_kernel(%arg0: i32, %arg1: i32, %arg2: memref<8x128xf32, #tpu.memory_space<vmem>>, %arg3: memref<8x128xf32, #tpu.memory_space<vmem>>, %arg4: memref<8x128xf32, #tpu.memory_space<vmem>>, %arg5: memref<8x128xf32, #tpu.memory_space<vmem>>) attributes {dimension_semantics = [#tpu.dimension_semantics<parallel>, #tpu.dimension_semantics<arbitrary>], iteration_bounds = array<i64: 1, 1>, scalar_prefetch = 0 : i64, scratch_operands = 1 : i64, tpu.core_type = #tpu.core_type<tc>, window_params = [{transform_indices = @transform_0, window_bounds = array<i64: 8, 128>}, {transform_indices = @transform_1, window_bounds = array<i64: 8, 128>}, {transform_indices = @transform_2, window_bounds = array<i64: 8, 128>}]} {
    %c0_i32 = arith.constant 0 : i32
    %0 = arith.cmpi eq, %arg1, %c0_i32 : i32
    %1 = arith.extui %0 : i1 to i32
    %c0_i32_0 = arith.constant 0 : i32
    %2 = arith.cmpi ne, %1, %c0_i32_0 : i32
    scf.if %2 {
      %cst_10 = arith.constant 0.000000e+00 : f32
      %14 = vector.broadcast %cst_10 : f32 to vector<8x128xf32>
      %c0_11 = arith.constant 0 : index
      %c0_12 = arith.constant 0 : index
      %15 = vector.load %arg5[%c0_11, %c0_12] : memref<8x128xf32, #tpu.memory_space<vmem>>, vector<8x128xf32>
      tpu.vector_store %arg5[%c0_11, %c0_12], %14 {strides = array<i32>} : memref<8x128xf32, #tpu.memory_space<vmem>>, vector<8x128xf32>,
    } else {
    }
    %c0 = arith.constant 0 : index
    %c0_1 = arith.constant 0 : index
    %3 = vector.load %arg2[%c0, %c0_1] : memref<8x128xf32, #tpu.memory_space<vmem>>, vector<8x128xf32>
    %c0_2 = arith.constant 0 : index
    %c0_3 = arith.constant 0 : index
    %4 = vector.load %arg3[%c0_2, %c0_3] : memref<8x128xf32, #tpu.memory_space<vmem>>, vector<8x128xf32>
    %5 = arith.mulf %3, %4 : vector<8x128xf32>
    %c0_4 = arith.constant 0 : index
    %c0_5 = arith.constant 0 : index
    %6 = vector.load %arg5[%c0_4, %c0_5] : memref<8x128xf32, #tpu.memory_space<vmem>>, vector<8x128xf32>
    %7 = vector.shape_cast %5 : vector<8x128xf32> to vector<1x8x128xf32>
    %cst = arith.constant dense<0.000000e+00> : vector<8x128xf32>
    %8 = vector.multi_reduction <add>, %7, %cst [0] : vector<1x8x128xf32> to vector<8x128xf32>
    %9 = arith.addf %6, %8 : vector<8x128xf32>
    %c0_6 = arith.constant 0 : index
    %c0_7 = arith.constant 0 : index
    %10 = vector.load %arg5[%c0_6, %c0_7] : memref<8x128xf32, #tpu.memory_space<vmem>>, vector<8x128xf32>
    tpu.vector_store %arg5[%c0_6, %c0_7], %9 {strides = array<i32>} : memref<8x128xf32, #tpu.memory_space<vmem>>, vector<8x128xf32>,
    %c0_i32_8 = arith.constant 0 : i32
    %11 = arith.cmpi eq, %arg1, %c0_i32_8 : i32
    %12 = arith.extui %11 : i1 to i32
    %c0_i32_9 = arith.constant 0 : i32
    %13 = arith.cmpi ne, %12, %c0_i32_9 : i32
    scf.if %13 {
      %c0_10 = arith.constant 0 : index
      %c0_11 = arith.constant 0 : index
      %14 = vector.load %arg5[%c0_10, %c0_11] : memref<8x128xf32, #tpu.memory_space<vmem>>, vector<8x128xf32>
      %c0_12 = arith.constant 0 : index
      %c0_13 = arith.constant 0 : index
      %15 = vector.load %arg4[%c0_12, %c0_13] : memref<8x128xf32, #tpu.memory_space<vmem>>, vector<8x128xf32>
      tpu.vector_store %arg4[%c0_12, %c0_13], %14 {strides = array<i32>} : memref<8x128xf32, #tpu.memory_space<vmem>>, vector<8x128xf32>,
    } else {
    }
    return
  }
  func.func @transform_0(%arg0: i32, %arg1: i32) -> (i32, i32) {
    %c1_i32 = arith.constant 1 : i32
    %0 = arith.muli %arg0, %c1_i32 : i32
    %1 = arith.addi %0, %arg1 : i32
    %c0_i32 = arith.constant 0 : i32
    %c0_i32_0 = arith.constant 0 : i32
    return %1, %c0_i32 : i32, i32
  }
  func.func @transform_1(%arg0: i32, %arg1: i32) -> (i32, i32) {
    %c1_i32 = arith.constant 1 : i32
    %0 = arith.muli %arg0, %c1_i32 : i32
    %1 = arith.addi %0, %arg1 : i32
    %c0_i32 = arith.constant 0 : i32
    %c0_i32_0 = arith.constant 0 : i32
    return %1, %c0_i32 : i32, i32
  }
  func.func @transform_2(%arg0: i32, %arg1: i32) -> (i32, i32) {
    %c0_i32 = arith.constant 0 : i32
    %c0_i32_0 = arith.constant 0 : i32
    return %arg0, %c0_i32 : i32, i32
  }
}

</mosaic_0001>

<bundles_post_ra>
// kernel: tpu_custom_call.1
= control target key start
LH: loop header
LB: loop body
LE: loop exit
PB: predicated region body
PF: predicated region fallthrough
CT: control target
= control target key end

     0   :  { %7 = vsyncpa [#allocation4], 0  ;;  %s191_s0 = inlined_call_operand.hbm [shape: f32[8,128], index: 0, kind: input, shape index: {}]   ;;  %s192_s1 = inlined_call_operand.hbm [shape: f32[8,128], index: 1, kind: input, shape index: {}]   ;;  %s193_s2 = inlined_call_operand.hbm [shape: f32[8,128], index: 2, kind: output, shape index: {}]  }
   0x1   :  { %8 = vsyncpa [#allocation7], 0 }
   0x2   :  { %9 = vsyncpa [#allocation5], 0  ;;  %s18_s11 = sshll.u32 %s191_s0, 4  ;;  %s164_s12 = smov [#allocation3]   ;;  %s19_s11 = int_to_ptr.hbm [resolvable:$true] %s18_s11 }
   0x3   :  { %s20_s13 = sshll.u32 %s164_s12, 4  ;;  %s32_s16 = sshll.u32 %s192_s1, 4  ;;  %s21_s13 = int_to_ptr.vmem [resolvable:$true] %s20_s13  ;;  %s33_s16 = int_to_ptr.hbm [resolvable:$true] %s32_s16 }
   0x4   :  { %23 = dma.hbm_to_vmem [thread:$0]  %s19_s11, 128, %s21_s13, [#allocation4]  }
   0x5   :  { %s165_s17 = smov [#allocation6]  }
   0x6   :  { %s34_s18 = sshll.u32 %s165_s17, 4  ;;  %s35_s18 = int_to_ptr.vmem [resolvable:$true] %s34_s18 }
   0x7   :  { %37 = dma.hbm_to_vmem [thread:$0]  %s33_s16, 128, %s35_s18, [#allocation7]  }
   0x8   :  { %158 = dma.done.wait [#allocation4], 128  }
   0x9   :  { %159 = vsyncadd [#allocation4], 4294967168 }
   0xa   :  { %160 = dma.done.wait [#allocation7], 128  }
   0xb   :  { %161 = vsyncadd [#allocation7], 4294967168  ;;  %s166_s19 = smov [#allocation8]   ;;  %s72_s22 = sshll.u32 %s193_s2, 4  ;;  %v53_v0 = vld [vmem:[#allocation3] sm:$0xff]  ;;  %v54_v1 = vld [vmem:[#allocation6] sm:$0xff]  ;;  %s73_s22 = int_to_ptr.hbm [resolvable:$true] %s72_s22 }
   0xc   :  { %s70_s0 = sshll.u32 %s166_s19, 4  ;;  %v55_v2 = vmul.f32 %v54_v1, %v53_v0  ;;  %s71_s0 = int_to_ptr.vmem [resolvable:$true] %s70_s0 }
   0xe   :  { %64 = vst [vmem:[#allocation8] sm:$0xff] %v55_v2 }
   0xf   :  { %75 = dma.vmem_to_hbm [thread:$0]  %s71_s0, 128, %s73_s22, [#allocation5]  }
  0x10   :  { %162 = dma.done.wait [#allocation5], 128  }
  0x11   :  { %163 = vsyncadd [#allocation5], 4294967168 }
  0x12   :  { %80 = vsyncpa [#allocation4], 1 }
  0x13   :  { %81 = vsyncpa [#allocation7], 1 }
  0x14   :  { %82 = vsyncpa [#allocation5], 1 }

</bundles_post_ra>
